<compile_context>
chip_gen: v7x
topology: tpu7x:2x2x1
jax: 0.10.0
libtpu: 0.0.40
codegen_flags: <defaults>
</compile_context>

<pallas_src>
import jax
import jax.numpy as jnp
import numpy as np
from jax.experimental import pallas as pl
from jax.experimental.pallas import tpu as pltpu

P = 1000  # DeepONet common output width (hard-coded in the PyTorch module)


def _round_up(x, m):
    return -(-x // m) * m


# ----------------------------------------------------------------------------
# Kernel
# ----------------------------------------------------------------------------
def deeponet_kernel(xb_ref, xt_ref,
                    at_ref, u_ref,
                    w1_ref, b1_ref,
                    w2_ref, b2_ref,
                    w3_ref, b3_ref,
                    w4_ref, b4_ref,
                    out_ref):
    f32 = jnp.float32
    xb = xb_ref[...]          # [Fb_p, tb]  branch input, feature-major
    xt = xt_ref[...]          # [Ft_p, tb]  trunk input, feature-major

    # ---- trunk net hidden: 4 x (Linear + Tanh), feature-major [C, tb] ----
    h = jnp.tanh(jnp.dot(w1_ref[...], xt, preferred_element_type=f32) + b1_ref[...])
    h = jnp.tanh(jnp.dot(w2_ref[...], h, preferred_element_type=f32) + b2_ref[...])
    h = jnp.tanh(jnp.dot(w3_ref[...], h, preferred_element_type=f32) + b3_ref[...])
    h = jnp.tanh(jnp.dot(w4_ref[...], h, preferred_element_type=f32) + b4_ref[...])

    # ---- collapsed bilinear combine ----
    # z[c, b] = sum_fb (W5^T diag(lw) Wb)[c, fb] * xb[fb, b]
    z = jnp.dot(at_ref[...], xb, preferred_element_type=f32)        # [C, tb]
    # out = sum_c z*h   (W5/lw part)  +  sum_fb u*xb   (b5/lw part)
    out_ref[...] = (jnp.sum(z * h, axis=0, keepdims=True)
                    + jnp.sum(u_ref[...] * xb, axis=0, keepdims=True))   # [1, tb]


# ----------------------------------------------------------------------------
# Parameters (PyTorch nn.Linear layout: weight [out, in], bias [out])
# ----------------------------------------------------------------------------
def init_params(key, branch_features, trunk_features, common_features):
    ks = jax.random.split(key, 12)

    def lin(kw, kb, fan_in, fan_out, bias=True):
        bound = 1.0 / float(fan_in) ** 0.5
        w = jax.random.uniform(kw, (fan_out, fan_in), jnp.float32, -bound, bound)
        if not bias:
            return w, None
        b = jax.random.uniform(kb, (fan_out,), jnp.float32, -bound, bound)
        return w, b

    wb, _ = lin(ks[0], ks[0], branch_features, P, bias=False)
    w1, b1 = lin(ks[1], ks[2], trunk_features, common_features)
    w2, b2 = lin(ks[3], ks[4], common_features, common_features)
    w3, b3 = lin(ks[5], ks[6], common_features, common_features)
    w4, b4 = lin(ks[7], ks[8], common_features, common_features)
    w5, b5 = lin(ks[9], ks[10], common_features, P)
    last_w = jax.random.normal(ks[11], (P,), jnp.float32)   # torch.randn(1000)
    return (wb, w1, b1, w2, b2, w3, b3, w4, b4, w5, b5, last_w)


def prepare_params(params):
    """One-time f32 host/JAX-side prep: collapse the P=1000 axis into
    At = W5^T diag(last_w) Wb and u = Wb^T diag(last_w) b5, pad feature dims
    to multiples of 8 sublanes, reshape biases/u to columns."""
    (wb, w1, b1, w2, b2, w3, b3, w4, b4, w5, b5, last_w) = params
    f32 = jnp.float32
    hi = jax.lax.Precision.HIGHEST

    Fb, Ft = wb.shape[1], w1.shape[1]
    Fb_p, Ft_p = _round_up(Fb, 8), _round_up(Ft, 8)

    wbl = (wb * last_w[:, None]).astype(f32)                       # diag(lw) @ Wb : [P, Fb]
    at = jnp.dot(w5.T.astype(f32), wbl, precision=hi)              # [C, Fb]
    u = jnp.dot(wbl.T, b5.astype(f32), precision=hi)               # [Fb]

    at_p = jnp.pad(at, ((0, 0), (0, Fb_p - Fb)))
    u_p = jnp.pad(u, ((0, Fb_p - Fb),)).reshape(Fb_p, 1)
    w1_p = jnp.pad(w1, ((0, 0), (0, Ft_p - Ft))).astype(f32)

    col = lambda b: b.reshape(-1, 1).astype(f32)
    return (at_p.astype(f32), u_p.astype(f32),
            w1_p, col(b1),
            w2.astype(f32), col(b2),
            w3.astype(f32), col(b3),
            w4.astype(f32), col(b4))


# ----------------------------------------------------------------------------
# Forward wrapper
# ----------------------------------------------------------------------------
def _choose_tile(batch, max_tile=2048):
    """grid=1 on single-TC chips (v5e/v6e); >=2 tiles on 2-TC chips (v7x)."""
    try:
        kind = jax.devices()[0].device_kind.lower()
    except Exception:
        kind = ""
    two_tc = ("v7" in kind) or ("7x" in kind)
    bp = _round_up(batch, 128)
    if two_tc and bp >= 256 and bp % 256 == 0:
        tb = min(bp // 2, max_tile)      # one tile per TensorCore
    else:
        tb = min(bp, max_tile)           # single tile: no per-step overhead
    return tb, _round_up(batch, tb)


def deeponet_forward(branch_in, trunk_in, prepped, *, tb=None):
    """Fused DeepONet forward via pallas_call. Inputs are batch-major [B, F]."""
    B, Fb = branch_in.shape
    Bt, Ft = trunk_in.shape
    assert B == Bt

    (at, u, w1, b1, w2, b2, w3, b3, w4, b4) = prepped
    C, Fb_p = at.shape
    Ft_p = w1.shape[1]

    if tb is None:
        tb, Bp = _choose_tile(B)
    else:
        assert tb % 128 == 0, "batch tile must be a multiple of 128 lanes"
        Bp = _round_up(B, tb)

    f32 = jnp.float32
    # Pad batch to a multiple of the tile and go feature-major.
    xb = jnp.pad(branch_in, ((0, Bp - B), (0, Fb_p - Fb))).T.astype(f32)  # [Fb_p, Bp]
    xt = jnp.pad(trunk_in, ((0, Bp - B), (0, Ft_p - Ft))).T.astype(f32)   # [Ft_p, Bp]

    batch_map = lambda i: (0, i)   # tile the lane (batch) axis
    const_map = lambda i: (0, 0)   # weights resident (fetched once)

    weights = (at, u, w1, b1, w2, b2, w3, b3, w4, b4)
    weight_specs = [pl.BlockSpec(w.shape, const_map) for w in weights]

    flops = 2 * Bp * (C * Fb_p + C * Ft_p + 3 * C * C) + Bp * (3 * C + 3 * Fb_p)
    bytes_accessed = int((xb.size + xt.size + Bp) * 4
                         + sum(int(w.size) for w in weights) * 4)

    out_row = pl.pallas_call(
        deeponet_kernel,
        out_shape=jax.ShapeDtypeStruct((1, Bp), f32),
        grid_spec=pltpu.PrefetchScalarGridSpec(
            num_scalar_prefetch=0,
            grid=(Bp // tb,),
            in_specs=[pl.BlockSpec((Fb_p, tb), batch_map),
                      pl.BlockSpec((Ft_p, tb), batch_map)] + weight_specs,
            out_specs=pl.BlockSpec((1, tb), batch_map),
        ),
        compiler_params=pltpu.CompilerParams(
            dimension_semantics=("parallel",)),
        cost_estimate=pl.CostEstimate(
            flops=int(flops),
            transcendentals=int(4 * Bp * C),
            bytes_accessed=bytes_accessed),
    )(xb, xt, *weights)

    return out_row.reshape(Bp, 1)[:B]


# ----------------------------------------------------------------------------
# Reference (float64 numpy, mirrors the PyTorch forward exactly)
# ----------------------------------------------------------------------------
def deeponet_ref(branch_in, trunk_in, params):
    p = [np.asarray(x, dtype=np.float64) for x in params]
    (wb, w1, b1, w2, b2, w3, b3, w4, b4, w5, b5, last_w) = p
    xb = np.asarray(branch_in, np.float64)
    xt = np.asarray(trunk_in, np.float64)
    bo = xb @ wb.T
    h = np.tanh(xt @ w1.T + b1)
    h = np.tanh(h @ w2.T + b2)
    h = np.tanh(h @ w3.T + b3)
    h = np.tanh(h @ w4.T + b4)
    to = h @ w5.T + b5
    return np.sum(bo * to * last_w, axis=1, keepdims=True)


if __name__ == "__main__":
    # batch=512, branch_features=16, trunk_features=2 (2D Helmholtz coords),
    # common_features=32.  Tile is chosen per-chip (512 on v5e/v6e, 256 on v7x).
    B, Fb, Ft, C = 512, 16, 2, 32

    key = jax.random.PRNGKey(0)
    k_branch, k_trunk, k_params = jax.random.split(key, 3)

    branch_in = jax.random.normal(k_branch, (B, Fb), jnp.float32)
    trunk_in = jax.random.normal(k_trunk, (B, Ft), jnp.float32)
    params = init_params(k_params, Fb, Ft, C)
    prepped = prepare_params(params)

    out = deeponet_forward(branch_in, trunk_in, prepped)
    out = jax.block_until_ready(out)
    assert out.shape == (B, 1)

    # Check vs a float64 reference of the exact PyTorch forward.  The kernel is
    # all-f32 (expected error ~1e-5 relative); allow margin for MXU f32 passes
    # and the reassociated (pre-contracted) combine.
    ref = deeponet_ref(branch_in, trunk_in, params)
    scale = max(1.0, float(np.max(np.abs(ref))))
    err = float(np.max(np.abs(np.asarray(out, dtype=np.float64) - ref)))
    assert err < 2e-2 * scale, f"max abs err {err} vs scale {scale}"

    print("KERNEL_OK")
</pallas_src>

<mosaic_0001>
module attributes {stable_mosaic.version = 11 : i64} {
  func.func @deeponet_kernel(%arg0: i32, %arg1: memref<16x512xf32, #tpu.memory_space<vmem>>, %arg2: memref<8x512xf32, #tpu.memory_space<vmem>>, %arg3: memref<32x16xf32, #tpu.memory_space<vmem>>, %arg4: memref<16x1xf32, #tpu.memory_space<vmem>>, %arg5: memref<32x8xf32, #tpu.memory_space<vmem>>, %arg6: memref<32x1xf32, #tpu.memory_space<vmem>>, %arg7: memref<32x32xf32, #tpu.memory_space<vmem>>, %arg8: memref<32x1xf32, #tpu.memory_space<vmem>>, %arg9: memref<32x32xf32, #tpu.memory_space<vmem>>, %arg10: memref<32x1xf32, #tpu.memory_space<vmem>>, %arg11: memref<32x32xf32, #tpu.memory_space<vmem>>, %arg12: memref<32x1xf32, #tpu.memory_space<vmem>>, %arg13: memref<1x512xf32, #tpu.memory_space<vmem>>) attributes {dimension_semantics = [#tpu.dimension_semantics<parallel>], iteration_bounds = array<i64: 1>, scalar_prefetch = 0 : i64, scratch_operands = 0 : i64, tpu.core_type = #tpu.core_type<tc>, window_params = [{transform_indices = @transform_0, window_bounds = array<i64: 16, 512>}, {transform_indices = @transform_1, window_bounds = array<i64: 8, 512>}, {pipeline_mode = #tpu.pipeline_mode<synchronous>, transform_indices = @transform_2, window_bounds = array<i64: 32, 16>}, {pipeline_mode = #tpu.pipeline_mode<synchronous>, transform_indices = @transform_3, window_bounds = array<i64: 16, 1>}, {pipeline_mode = #tpu.pipeline_mode<synchronous>, transform_indices = @transform_4, window_bounds = array<i64: 32, 8>}, {pipeline_mode = #tpu.pipeline_mode<synchronous>, transform_indices = @transform_5, window_bounds = array<i64: 32, 1>}, {pipeline_mode = #tpu.pipeline_mode<synchronous>, transform_indices = @transform_6, window_bounds = array<i64: 32, 32>}, {pipeline_mode = #tpu.pipeline_mode<synchronous>, transform_indices = @transform_7, window_bounds = array<i64: 32, 1>}, {pipeline_mode = #tpu.pipeline_mode<synchronous>, transform_indices = @transform_8, window_bounds = array<i64: 32, 32>}, {pipeline_mode = #tpu.pipeline_mode<synchronous>, transform_indices = @transform_9, window_bounds = array<i64: 32, 1>}, {pipeline_mode = #tpu.pipeline_mode<synchronous>, transform_indices = @transform_10, window_bounds = array<i64: 32, 32>}, {pipeline_mode = #tpu.pipeline_mode<synchronous>, transform_indices = @transform_11, window_bounds = array<i64: 32, 1>}, {transform_indices = @transform_12, window_bounds = array<i64: 1, 512>}]} {
    %c0 = arith.constant 0 : index
    %c0_0 = arith.constant 0 : index
    %0 = vector.load %arg1[%c0, %c0_0] : memref<16x512xf32, #tpu.memory_space<vmem>>, vector<16x512xf32>
    %c0_1 = arith.constant 0 : index
    %c0_2 = arith.constant 0 : index
    %1 = vector.load %arg2[%c0_1, %c0_2] : memref<8x512xf32, #tpu.memory_space<vmem>>, vector<8x512xf32>
    %c0_3 = arith.constant 0 : index
    %c0_4 = arith.constant 0 : index
    %2 = vector.load %arg5[%c0_3, %c0_4] : memref<32x8xf32, #tpu.memory_space<vmem>>, vector<32x8xf32>
    %cst = arith.constant dense<0.000000e+00> : vector<32x512xf32>
    %3 = tpu.matmul %2, %1, %cst {dimension_numbers = #tpu.dot_dimension_numbers<[1], [0], [0], [1], [0, 0, 1, 1], [], []>} : vector<32x8xf32>, vector<8x512xf32>, vector<32x512xf32> -> vector<32x512xf32>
    %c0_5 = arith.constant 0 : index
    %c0_6 = arith.constant 0 : index
    %4 = vector.load %arg6[%c0_5, %c0_6] : memref<32x1xf32, #tpu.memory_space<vmem>>, vector<32x1xf32>
    %5 = vector.broadcast %4 : vector<32x1xf32> to vector<32x512xf32>
    %6 = arith.addf %3, %5 : vector<32x512xf32>
    %7 = math.tanh %6 : vector<32x512xf32>
    %c0_7 = arith.constant 0 : index
    %c0_8 = arith.constant 0 : index
    %8 = vector.load %arg7[%c0_7, %c0_8] : memref<32x32xf32, #tpu.memory_space<vmem>>, vector<32x32xf32>
    %cst_9 = arith.constant dense<0.000000e+00> : vector<32x512xf32>
    %9 = tpu.matmul %8, %7, %cst_9 {dimension_numbers = #tpu.dot_dimension_numbers<[1], [0], [0], [1], [0, 0, 1, 1], [], []>} : vector<32x32xf32>, vector<32x512xf32>, vector<32x512xf32> -> vector<32x512xf32>
    %c0_10 = arith.constant 0 : index
    %c0_11 = arith.constant 0 : index
    %10 = vector.load %arg8[%c0_10, %c0_11] : memref<32x1xf32, #tpu.memory_space<vmem>>, vector<32x1xf32>
    %11 = vector.broadcast %10 : vector<32x1xf32> to vector<32x512xf32>
    %12 = arith.addf %9, %11 : vector<32x512xf32>
    %13 = math.tanh %12 : vector<32x512xf32>
    %c0_12 = arith.constant 0 : index
    %c0_13 = arith.constant 0 : index
    %14 = vector.load %arg9[%c0_12, %c0_13] : memref<32x32xf32, #tpu.memory_space<vmem>>, vector<32x32xf32>
    %cst_14 = arith.constant dense<0.000000e+00> : vector<32x512xf32>
    %15 = tpu.matmul %14, %13, %cst_14 {dimension_numbers = #tpu.dot_dimension_numbers<[1], [0], [0], [1], [0, 0, 1, 1], [], []>} : vector<32x32xf32>, vector<32x512xf32>, vector<32x512xf32> -> vector<32x512xf32>
    %c0_15 = arith.constant 0 : index
    %c0_16 = arith.constant 0 : index
    %16 = vector.load %arg10[%c0_15, %c0_16] : memref<32x1xf32, #tpu.memory_space<vmem>>, vector<32x1xf32>
    %17 = vector.broadcast %16 : vector<32x1xf32> to vector<32x512xf32>
    %18 = arith.addf %15, %17 : vector<32x512xf32>
    %19 = math.tanh %18 : vector<32x512xf32>
    %c0_17 = arith.constant 0 : index
    %c0_18 = arith.constant 0 : index
    %20 = vector.load %arg11[%c0_17, %c0_18] : memref<32x32xf32, #tpu.memory_space<vmem>>, vector<32x32xf32>
    %cst_19 = arith.constant dense<0.000000e+00> : vector<32x512xf32>
    %21 = tpu.matmul %20, %19, %cst_19 {dimension_numbers = #tpu.dot_dimension_numbers<[1], [0], [0], [1], [0, 0, 1, 1], [], []>} : vector<32x32xf32>, vector<32x512xf32>, vector<32x512xf32> -> vector<32x512xf32>
    %c0_20 = arith.constant 0 : index
    %c0_21 = arith.constant 0 : index
    %22 = vector.load %arg12[%c0_20, %c0_21] : memref<32x1xf32, #tpu.memory_space<vmem>>, vector<32x1xf32>
    %23 = vector.broadcast %22 : vector<32x1xf32> to vector<32x512xf32>
    %24 = arith.addf %21, %23 : vector<32x512xf32>
    %25 = math.tanh %24 : vector<32x512xf32>
    %c0_22 = arith.constant 0 : index
    %c0_23 = arith.constant 0 : index
    %26 = vector.load %arg3[%c0_22, %c0_23] : memref<32x16xf32, #tpu.memory_space<vmem>>, vector<32x16xf32>
    %cst_24 = arith.constant dense<0.000000e+00> : vector<32x512xf32>
    %27 = tpu.matmul %26, %0, %cst_24 {dimension_numbers = #tpu.dot_dimension_numbers<[1], [0], [0], [1], [0, 0, 1, 1], [], []>} : vector<32x16xf32>, vector<16x512xf32>, vector<32x512xf32> -> vector<32x512xf32>
    %28 = arith.mulf %27, %25 : vector<32x512xf32>
    %cst_25 = arith.constant dense<0.000000e+00> : vector<512xf32>
    %29 = vector.multi_reduction <add>, %28, %cst_25 [0] : vector<32x512xf32> to vector<512xf32>
    %30 = vector.shape_cast %29 : vector<512xf32> to vector<1x512xf32>
    %c0_26 = arith.constant 0 : index
    %c0_27 = arith.constant 0 : index
    %31 = vector.load %arg4[%c0_26, %c0_27] : memref<16x1xf32, #tpu.memory_space<vmem>>, vector<16x1xf32>
    %32 = vector.broadcast %31 : vector<16x1xf32> to vector<16x512xf32>
    %33 = arith.mulf %32, %0 : vector<16x512xf32>
    %cst_28 = arith.constant dense<0.000000e+00> : vector<512xf32>
    %34 = vector.multi_reduction <add>, %33, %cst_28 [0] : vector<16x512xf32> to vector<512xf32>
    %35 = vector.shape_cast %34 : vector<512xf32> to vector<1x512xf32>
    %36 = arith.addf %30, %35 : vector<1x512xf32>
    %c0_29 = arith.constant 0 : index
    %c0_30 = arith.constant 0 : index
    %37 = vector.load %arg13[%c0_29, %c0_30] : memref<1x512xf32, #tpu.memory_space<vmem>>, vector<1x512xf32>
    tpu.vector_store %arg13[%c0_29, %c0_30], %36 {strides = array<i32>} : memref<1x512xf32, #tpu.memory_space<vmem>>, vector<1x512xf32>,
    return
  }
  func.func @transform_0(%arg0: i32) -> (i32, i32) {
    %c0_i32 = arith.constant 0 : i32
    %c0_i32_0 = arith.constant 0 : i32
    return %c0_i32, %arg0 : i32, i32
  }
  func.func @transform_1(%arg0: i32) -> (i32, i32) {
    %c0_i32 = arith.constant 0 : i32
    %c0_i32_0 = arith.constant 0 : i32
    return %c0_i32, %arg0 : i32, i32
  }
  func.func @transform_2(%arg0: i32) -> (i32, i32) {
    %c0_i32 = arith.constant 0 : i32
    %c0_i32_0 = arith.constant 0 : i32
    %c0_i32_1 = arith.constant 0 : i32
    return %c0_i32, %c0_i32_0 : i32, i32
  }
  func.func @transform_3(%arg0: i32) -> (i32, i32) {
    %c0_i32 = arith.constant 0 : i32
    %c0_i32_0 = arith.constant 0 : i32
    %c0_i32_1 = arith.constant 0 : i32
    return %c0_i32, %c0_i32_0 : i32, i32
  }
  func.func @transform_4(%arg0: i32) -> (i32, i32) {
    %c0_i32 = arith.constant 0 : i32
    %c0_i32_0 = arith.constant 0 : i32
    %c0_i32_1 = arith.constant 0 : i32
    return %c0_i32, %c0_i32_0 : i32, i32
  }
  func.func @transform_5(%arg0: i32) -> (i32, i32) {
    %c0_i32 = arith.constant 0 : i32
    %c0_i32_0 = arith.constant 0 : i32
    %c0_i32_1 = arith.constant 0 : i32
    return %c0_i32, %c0_i32_0 : i32, i32
  }
  func.func @transform_6(%arg0: i32) -> (i32, i32) {
    %c0_i32 = arith.constant 0 : i32
    %c0_i32_0 = arith.constant 0 : i32
    %c0_i32_1 = arith.constant 0 : i32
    return %c0_i32, %c0_i32_0 : i32, i32
  }
  func.func @transform_7(%arg0: i32) -> (i32, i32) {
    %c0_i32 = arith.constant 0 : i32
    %c0_i32_0 = arith.constant 0 : i32
    %c0_i32_1 = arith.constant 0 : i32
    return %c0_i32, %c0_i32_0 : i32, i32
  }
  func.func @transform_8(%arg0: i32) -> (i32, i32) {
    %c0_i32 = arith.constant 0 : i32
    %c0_i32_0 = arith.constant 0 : i32
    %c0_i32_1 = arith.constant 0 : i32
    return %c0_i32, %c0_i32_0 : i32, i32
  }
  func.func @transform_9(%arg0: i32) -> (i32, i32) {
    %c0_i32 = arith.constant 0 : i32
    %c0_i32_0 = arith.constant 0 : i32
    %c0_i32_1 = arith.constant 0 : i32
    return %c0_i32, %c0_i32_0 : i32, i32
  }
  func.func @transform_10(%arg0: i32) -> (i32, i32) {
    %c0_i32 = arith.constant 0 : i32
    %c0_i32_0 = arith.constant 0 : i32
    %c0_i32_1 = arith.constant 0 : i32
    return %c0_i32, %c0_i32_0 : i32, i32
  }
  func.func @transform_11(%arg0: i32) -> (i32, i32) {
    %c0_i32 = arith.constant 0 : i32
    %c0_i32_0 = arith.constant 0 : i32
    %c0_i32_1 = arith.constant 0 : i32
    return %c0_i32, %c0_i32_0 : i32, i32
  }
  func.func @transform_12(%arg0: i32) -> (i32, i32) {
    %c0_i32 = arith.constant 0 : i32
    %c0_i32_0 = arith.constant 0 : i32
    return %c0_i32, %arg0 : i32, i32
  }
}

</mosaic_0001>

<bundles_post_ra>
// kernel: tpu_custom_call.1
= control target key start
LH: loop header
LB: loop body
LE: loop exit
PB: predicated region body
PF: predicated region fallthrough
CT: control target
= control target key end

     0   :  { %vm82_vm0 = vcmask 64512   ;;  %v1593_v5 = vmov 0.0   ;;  %v1594_v9 = vmov 0   ;;  %s1936_s0 = inlined_call_operand.vmem [shape: f32[16,512], index: 0, kind: input, shape index: {}]   ;;  %s1937_s1 = inlined_call_operand.vmem [shape: f32[8,512], index: 1, kind: input, shape index: {}]   ;;  %s1938_s2 = inlined_call_operand.vmem [shape: f32[32,16], index: 2, kind: input, shape index: {}]   ;;  %s1939_s3 = inlined_call_operand.vmem [shape: f32[16,1], index: 3, kind: input, shape index: {}]   ;;  %s1940_s4 = inlined_call_operand.vmem [shape: f32[32,8], index: 4, kind: input, shape index: {}]   ;;  %s1941_s5 = inlined_call_operand.vmem [shape: f32[32,1], index: 5, kind: input, shape index: {}]   ;;  %s1942_s6 = inlined_call_operand.vmem [shape: f32[32,32], index: 6, kind: input, shape index: {}]   ;;  %s1943_s7 = inlined_call_operand.vmem [shape: f32[32,1], index: 7, kind: input, shape index: {}]   ;;  %s1944_s8 = inlined_call_operand.vmem [shape: f32[32,32], index: 8, kind: input, shape index: {}]   ;;  %s1945_s9 = inlined_call_operand.vmem [shape: f32[32,1], index: 9, kind: input, shape index: {}]   ;;  %s1946_s10 = inlined_call_operand.vmem [shape: f32[32,32], index: 10, kind: input, shape index: {}]   ;;  %s1947_s11 = inlined_call_operand.vmem [shape: f32[32,1], index: 11, kind: input, shape index: {}]   ;;  %s1948_s12 = inlined_call_operand.hbm [shape: f32[1,512], index: 12, kind: output, shape index: {}]  }
   0x1   :  { %v51_v0 = vld [vmem:[%s1937_s1 + $0x8] sm:$0xff]  ;;  %v53_v1 = vld [vmem:[%s1937_s1 + $0x18] sm:$0xff]  ;;  %v50_v2 = vld [vmem:[%s1937_s1] sm:$0xff]  ;;  %159 = vmatprep.mubr.f32.mxu0 %v1593_v5  ;;  %248 = vmatprep.mubr.f32.mxu1 %v1593_v5 }
   0x2   :  { %95 = vmatprep.subr.mxu0 %v51_v0  ;;  %184 = vmatprep.subr.mxu1 %v53_v1  ;;  %v52_v3 = vld [vmem:[%s1937_s1 + $0x10] sm:$0xff]  ;;  %v54_v4 = vld [vmem:[%s1940_s4] sm:$0xff]  ;;  %v55_v8 = vld [vmem:[%s1940_s4 + $0x8] sm:$0xff] }
   0x3   :  { %96 = vmatpush1.msra.mxu0 %v50_v2  ;;  %185 = vmatpush1.msra.mxu1 %v52_v3  ;;  %v60_v6 = vld [vmem:[%s1941_s5 + $0x10] sm:$0xff]  ;;  %v58_v7 = vld [vmem:[%s1941_s5] sm:$0xff]  ;;  %v61_v10 = vld [vmem:[%s1941_s5 + $0x18] sm:$0xff] }
   0x4   :  { %1339 = vmatmul.mubr.msk.f32.vlgmr.msra.gmra.mrb[0].mxu0 %vm82_vm0, %v54_v4  ;;  %1343 = vmatmul.mubr.msk.f32.vlgmr.msra.gmra.mrb[0].mxu1 %vm82_vm0, %v54_v4  ;;  %v59_v11 = vld [vmem:[%s1941_s5 + $0x8] sm:$0xff] }
   0x5   :  { %165 = vmatprep.mubr.f32.mxu0 %v1593_v5  ;;  %254 = vmatprep.mubr.f32.mxu1 %v1593_v5 }
   0x6   :  { %1440 = vset.pattern.permute.xlu1 %v1594_v9  ;;  %1439 = vset.pattern.permute.xlu0 %v1594_v9 }
   0x7   :  { %74 = vperm.xlu1 %1440, %v60_v6   ;;  %64 = vperm.xlu0 %1439, %v58_v7  }
   0x8   :  { %1340 = vmatmul.mubr.msk.f32.gmra.mrb[2].mxu0 %vm82_vm0, %v55_v8  ;;  %1344 = vmatmul.mubr.msk.f32.gmra.mrb[2].mxu1 %vm82_vm0, %v55_v8 }
   0x9   :  { %17 = vsyncpa [#allocation3], 0  ;;  %171 = vmatprep.mubr.f32.mxu0 %v1593_v5  ;;  %260 = vmatprep.mubr.f32.mxu1 %v1593_v5  ;;  %v56_v12 = vld [vmem:[%s1940_s4 + $0x10] sm:$0xff]  ;;  %v294_v13 = vld [vmem:[%s1943_s7 + $0x8] sm:$0xff]  ;;  %vm317_vm1 = vcmask 261120   ;;  %vm996_vm2 = vcmask 130048  }
   0xa   :  { %v293_v14 = vld [vmem:[%s1943_s7] sm:$0xff]  ;;  %v57_v15 = vld [vmem:[%s1940_s4 + $0x18] sm:$0xff]  ;;  %v295_v17 = vld [vmem:[%s1943_s7 + $0x10] sm:$0xff] }
   0xb   :  { %79 = vperm.xlu1 %1440, %v61_v10   ;;  %69 = vperm.xlu0 %1439, %v59_v11   ;;  %v296_v16 = vld [vmem:[%s1943_s7 + $0x18] sm:$0xff]  ;;  %v529_v18 = vld [vmem:[%s1945_s9 + $0x8] sm:$0xff]  ;;  %v528_v19 = vld [vmem:[%s1945_s9] sm:$0xff] }
   0xc   :  { %1341 = vmatmul.mubr.msk.f32.gmra.mrb[4].mxu0 %vm82_vm0, %v56_v12  ;;  %1345 = vmatmul.mubr.msk.f32.gmra.mrb[4].mxu1 %vm82_vm0, %v56_v12  ;;  %v531_v20 = vld [vmem:[%s1945_s9 + $0x18] sm:$0xff]  ;;  %v530_v21 = vld [vmem:[%s1945_s9 + $0x10] sm:$0xff]  ;;  %v763_v22 = vld [vmem:[%s1947_s11 + $0x8] sm:$0xff] }
   0xd   :  { %177 = vmatprep.mubr.f32.mxu0 %v1593_v5  ;;  %266 = vmatprep.mubr.f32.mxu1 %v1593_v5  ;;  %v762_v23 = vld [vmem:[%s1947_s11] sm:$0xff]  ;;  %v765_v24 = vld [vmem:[%s1947_s11 + $0x18] sm:$0xff]  ;;  %v764_v25 = vld [vmem:[%s1947_s11 + $0x10] sm:$0xff] }
   0xe   :  { %v1240_v26 = vld [vmem:[%s1939_s3 + $0x8] sm:$0xff]  ;;  %v1239_v27 = vld [vmem:[%s1939_s3] sm:$0xff] }
   0xf   :  { %304 = vperm.xlu1 %1440, %v294_v13   ;;  %299 = vperm.xlu0 %1439, %v293_v14  }
  0x10   :  { %1342 = vmatmul.mubr.msk.f32.gmra.mrb[6].mxu0 %vm82_vm0, %v57_v15  ;;  %1346 = vmatmul.mubr.msk.f32.gmra.mrb[6].mxu1 %vm82_vm0, %v57_v15 }
  0x11   :  { %394 = vmatprep.mubr.f32.mxu0 %v1593_v5  ;;  %483 = vmatprep.mubr.f32.mxu1 %v1593_v5 }
  0x13   :  { %314 = vperm.xlu1 %1440, %v296_v16   ;;  %309 = vperm.xlu0 %1439, %v295_v17  }
  0x17   :  { %539 = vperm.xlu1 %1440, %v529_v18   ;;  %534 = vperm.xlu0 %1439, %v528_v19  }
  0x1b   :  { %549 = vperm.xlu1 %1440, %v531_v20   ;;  %544 = vperm.xlu0 %1439, %v530_v21  }
  0x1f   :  { %773 = vperm.xlu1 %1440, %v763_v22   ;;  %768 = vperm.xlu0 %1439, %v762_v23  }
  0x23   :  { %783 = vperm.xlu1 %1440, %v765_v24   ;;  %778 = vperm.xlu0 %1439, %v764_v25   ;;  %v289_v25 = vld [vmem:[%s1942_s6] sm:$0xff] }
  0x27   :  { %1248 = vperm.xlu1 %1440, %v1240_v26   ;;  %1243 = vperm.xlu0 %1439, %v1239_v27   ;;  %v290_v26 = vld [vmem:[%s1942_s6 + $0x8] sm:$0xff]  ;;  %v291_v27 = vld [vmem:[%s1942_s6 + $0x10] sm:$0xff] }
  0x86   :  { %v65_v28 = vpop.permute.xlu0 %64  ;;  %v75_v37 = vpop.permute.xlu1 %74 }
  0x8a   :  { %v70_v38 = vpop.permute.xlu0 %69  ;;  %v80_v55 = vpop.permute.xlu1 %79 }
  0xd7   :  { %v161_v29 = vpop.f32.mrb[0].mxu0  ;;  %v250_v30 = vpop.f32.mrb[0].mxu1 }
  0xd8   :  { %v162_v31 = vadd.f32 %v161_v29, %v65_v28  ;;  %v251_v32 = vadd.f32 %v250_v30, %v65_v28  ;;  %v163_v33 = vpop.f32.mrb[1].mxu0  ;;  %v252_v34 = vpop.f32.mrb[1].mxu1 }
  0xd9   :  { %v164_v35 = vadd.f32 %v163_v33, %v65_v28  ;;  %v253_v36 = vadd.f32 %v252_v34, %v65_v28  ;;  %v292_v28 = vld [vmem:[%s1942_s6 + $0x18] sm:$0xff]  ;;  %v300_v29 = vpop.permute.xlu0 %299 }
  0xda   :  { %1441 = vtanh.f32 %v162_v31 }
  0xdb   :  { %1443 = vtanh.f32 %v251_v32  ;;  %v167_v39 = vpop.f32.mrb[2].mxu0  ;;  %v256_v40 = vpop.f32.mrb[2].mxu1 }
  0xdc   :  { %1445 = vtanh.f32 %v164_v35  ;;  %v168_v41 = vadd.f32 %v167_v39, %v70_v38  ;;  %v257_v42 = vadd.f32 %v256_v40, %v70_v38  ;;  %v169_v43 = vpop.f32.mrb[3].mxu0  ;;  %v258_v44 = vpop.f32.mrb[3].mxu1 }
  0xdd   :  { %1447 = vtanh.f32 %v253_v36  ;;  %v170_v45 = vadd.f32 %v169_v43, %v70_v38  ;;  %v259_v46 = vadd.f32 %v258_v44, %v70_v38  ;;  %v305_v38 = vpop.permute.xlu1 %304 }
  0xde   :  { %1449 = vtanh.f32 %v168_v41 }
  0xdf   :  { %1451 = vtanh.f32 %v257_v42  ;;  %v173_v47 = vpop.f32.mrb[4].mxu0  ;;  %v262_v48 = vpop.f32.mrb[4].mxu1 }
  0xe0   :  { %1453 = vtanh.f32 %v170_v45  ;;  %v174_v49 = vadd.f32 %v173_v47, %v75_v37  ;;  %v263_v50 = vadd.f32 %v262_v48, %v75_v37  ;;  %v175_v51 = vpop.f32.mrb[5].mxu0  ;;  %v264_v52 = vpop.f32.mrb[5].mxu1 }
  0xe1   :  { %1455 = vtanh.f32 %v259_v46  ;;  %v176_v53 = vadd.f32 %v175_v51, %v75_v37  ;;  %v265_v54 = vadd.f32 %v264_v52, %v75_v37  ;;  %v310_v47 = vpop.permute.xlu0 %309 }
  0xe2   :  { %1457 = vtanh.f32 %v174_v49 }
  0xe3   :  { %1459 = vtanh.f32 %v263_v50  ;;  %v179_v56 = vpop.f32.mrb[6].mxu0  ;;  %v268_v57 = vpop.f32.mrb[6].mxu1 }
  0xe4   :  { %v1442_v58 = vpop.eup %1441  ;;  %1461 = vtanh.f32 %v176_v53  ;;  %v180_v59 = vadd.f32 %v179_v56, %v80_v55  ;;  %v269_v60 = vadd.f32 %v268_v57, %v80_v55  ;;  %v181_v61 = vpop.f32.mrb[7].mxu0 }
  0xe5   :  { %v270_v62 = vpop.f32.mrb[7].mxu1  ;;  %v1444_v63 = vpop.eup %1443  ;;  %1463 = vtanh.f32 %v265_v54  ;;  %v182_v0 = vadd.f32 %v181_v61, %v80_v55 }
  0xe6   :  { %v271_v1 = vadd.f32 %v270_v62, %v80_v55  ;;  %v1446_v2 = vpop.eup %1445  ;;  %1465 = vtanh.f32 %v180_v59  ;;  %v315_v56 = vpop.permute.xlu1 %314 }
  0xe7   :  { %v1448_v3 = vpop.eup %1447  ;;  %1467 = vtanh.f32 %v269_v60 }
  0xe8   :  { %v1450_v4 = vpop.eup %1449  ;;  %1469 = vtanh.f32 %v182_v0 }
  0xe9   :  { %v1452_v6 = vpop.eup %1451  ;;  %1471 = vtanh.f32 %v271_v1  ;;  %v1381_v7 = vpack.c.bf16 %v1450_v4, %v1442_v58 }
  0xea   :  { %v1454_v8 = vpop.eup %1453  ;;  %v1389_v9 = vpack.c.bf16 %v1452_v6, %v1444_v63 }
  0xeb   :  { %v1456_v10 = vpop.eup %1455  ;;  %v1379_v11 = vpack.c.bf16 %v1454_v8, %v1446_v2 }
  0xec   :  { %v1458_v12 = vpop.eup %1457  ;;  %v1387_v13 = vpack.c.bf16 %v1456_v10, %v1448_v3 }
  0xed   :  { %v1460_v14 = vpop.eup %1459  ;;  %1380 = vmatprep.subr.bf16.mxu0 %v1379_v11 }
  0xee   :  { %v1462_v15 = vpop.eup %1461  ;;  %1388 = vmatprep.subr.bf16.mxu1 %v1387_v13  ;;  %1382 = vmatpush1.bf16.msra.mxu0 %v1381_v7 }
  0xef   :  { %v1464_v16 = vpop.eup %1463  ;;  %1390 = vmatpush1.bf16.msra.mxu1 %v1389_v9 }
  0xf0   :  { %v1466_v17 = vpop.eup %1465 }
  0xf1   :  { %v1468_v18 = vpop.eup %1467  ;;  %v1385_v19 = vpack.c.bf16 %v1466_v17, %v1458_v12 }
  0xf2   :  { %v1470_v20 = vpop.eup %1469  ;;  %v1393_v21 = vpack.c.bf16 %v1468_v18, %v1460_v14 }
  0xf3   :  { %v1472_v22 = vpop.eup %1471  ;;  %v1383_v23 = vpack.c.bf16 %v1470_v20, %v1462_v15 }
  0xf4   :  { %v1391_v24 = vpack.c.bf16 %v1472_v22, %v1464_v16 }
  0xf5   :  { %1384 = vmatprep.subr.bf16.mxu0 %v1383_v23 }
  0xf6   :  { %1392 = vmatprep.subr.bf16.mxu1 %v1391_v24  ;;  %1386 = vmatpush1.bf16.msra.mxu0 %v1385_v19 }
  0xf7   :  { %1394 = vmatpush1.bf16.msra.mxu1 %v1393_v21 }
  0xf9   :  { %1347 = vmatmul.mubr.msk.f32.vlgmr.msra.gmra.mrb[8].mxu0 %vm317_vm1, %v289_v25 }
  0xfa   :  { %1351 = vmatmul.mubr.msk.f32.vlgmr.msra.gmra.mrb[8].mxu1 %vm317_vm1, %v289_v25  ;;  %400 = vmatprep.mubr.f32.mxu0 %v1593_v5 }
  0xfb   :  { %489 = vmatprep.mubr.f32.mxu1 %v1593_v5 }
  0xfd   :  { %1348 = vmatmul.mubr.msk.f32.gmra.mrb[10].mxu0 %vm317_vm1, %v290_v26 }
  0xfe   :  { %1352 = vmatmul.mubr.msk.f32.gmra.mrb[10].mxu1 %vm317_vm1, %v290_v26  ;;  %406 = vmatprep.mubr.f32.mxu0 %v1593_v5  ;;  %v524_v26 = vld [vmem:[%s1944_s8] sm:$0xff] }
  0xff   :  { %495 = vmatprep.mubr.f32.mxu1 %v1593_v5 }
 0x101   :  { %1349 = vmatmul.mubr.msk.f32.gmra.mrb[12].mxu0 %vm317_vm1, %v291_v27 }
 0x102   :  { %1353 = vmatmul.mubr.msk.f32.gmra.mrb[12].mxu1 %vm317_vm1, %v291_v27  ;;  %412 = vmatprep.mubr.f32.mxu0 %v1593_v5  ;;  %v525_v27 = vld [vmem:[%s1944_s8 + $0x8] sm:$0xff] }
 0x103   :  { %501 = vmatprep.mubr.f32.mxu1 %v1593_v5 }
 0x105   :  { %1350 = vmatmul.mubr.msk.f32.gmra.mrb[14].mxu0 %vm317_vm1, %v292_v28 }
 0x106   :  { %1354 = vmatmul.mubr.msk.f32.gmra.mrb[14].mxu1 %vm317_vm1, %v292_v28  ;;  %628 = vmatprep.mubr.f32.mxu0 %v1593_v5  ;;  %v526_v28 = vld [vmem:[%s1944_s8 + $0x10] sm:$0xff] }
 0x107   :  { %717 = vmatprep.mubr.f32.mxu1 %v1593_v5 }
 0x1cc   :  { %v396_v30 = vpop.f32.mrb[8].mxu0 }
 0x1cd   :  { %v397_v31 = vadd.f32 %v396_v30, %v300_v29  ;;  %v485_v32 = vpop.f32.mrb[8].mxu1  ;;  %v398_v33 = vpop.f32.mrb[9].mxu0 }
 0x1ce   :  { %v486_v34 = vadd.f32 %v485_v32, %v300_v29  ;;  %v399_v35 = vadd.f32 %v398_v33, %v300_v29  ;;  %v487_v36 = vpop.f32.mrb[9].mxu1  ;;  %v535_v30 = vpop.permute.xlu0 %534 }
 0x1cf   :  { %1473 = vtanh.f32 %v397_v31  ;;  %v488_v37 = vadd.f32 %v487_v36, %v300_v29  ;;  %v527_v29 = vld [vmem:[%s1944_s8 + $0x18] sm:$0xff] }
 0x1d0   :  { %1475 = vtanh.f32 %v486_v34  ;;  %v402_v39 = vpop.f32.mrb[10].mxu0 }
 0x1d1   :  { %1477 = vtanh.f32 %v399_v35  ;;  %v403_v40 = vadd.f32 %v402_v39, %v305_v38  ;;  %v491_v41 = vpop.f32.mrb[10].mxu1  ;;  %v404_v42 = vpop.f32.mrb[11].mxu0 }
 0x1d2   :  { %1479 = vtanh.f32 %v488_v37  ;;  %v492_v43 = vadd.f32 %v491_v41, %v305_v38  ;;  %v405_v44 = vadd.f32 %v404_v42, %v305_v38  ;;  %v493_v45 = vpop.f32.mrb[11].mxu1  ;;  %v540_v39 = vpop.permute.xlu1 %539 }
 0x1d3   :  { %1481 = vtanh.f32 %v403_v40  ;;  %v494_v46 = vadd.f32 %v493_v45, %v305_v38 }
 0x1d4   :  { %1483 = vtanh.f32 %v492_v43  ;;  %v408_v48 = vpop.f32.mrb[12].mxu0 }
 0x1d5   :  { %1485 = vtanh.f32 %v405_v44  ;;  %v409_v49 = vadd.f32 %v408_v48, %v310_v47  ;;  %v497_v50 = vpop.f32.mrb[12].mxu1  ;;  %v410_v51 = vpop.f32.mrb[13].mxu0 }
 0x1d6   :  { %1487 = vtanh.f32 %v494_v46  ;;  %v498_v52 = vadd.f32 %v497_v50, %v310_v47  ;;  %v411_v53 = vadd.f32 %v410_v51, %v310_v47  ;;  %v499_v54 = vpop.f32.mrb[13].mxu1  ;;  %v545_v48 = vpop.permute.xlu0 %544 }
 0x1d7   :  { %1489 = vtanh.f32 %v409_v49  ;;  %v500_v55 = vadd.f32 %v499_v54, %v310_v47 }
 0x1d8   :  { %1491 = vtanh.f32 %v498_v52  ;;  %v414_v57 = vpop.f32.mrb[14].mxu0 }
 0x1d9   :  { %v1474_v58 = vpop.eup %1473  ;;  %1493 = vtanh.f32 %v411_v53  ;;  %v415_v59 = vadd.f32 %v414_v57, %v315_v56  ;;  %v503_v60 = vpop.f32.mrb[14].mxu1 }
 0x1da   :  { %v416_v61 = vpop.f32.mrb[15].mxu0  ;;  %v1476_v62 = vpop.eup %1475  ;;  %1495 = vtanh.f32 %v500_v55  ;;  %v504_v63 = vadd.f32 %v503_v60, %v315_v56 }
 0x1db   :  { %v417_v0 = vadd.f32 %v416_v61, %v315_v56  ;;  %v505_v1 = vpop.f32.mrb[15].mxu1  ;;  %v1478_v2 = vpop.eup %1477  ;;  %1497 = vtanh.f32 %v415_v59 }
 0x1dc   :  { %v506_v3 = vadd.f32 %v505_v1, %v315_v56  ;;  %v1480_v4 = vpop.eup %1479  ;;  %1499 = vtanh.f32 %v504_v63  ;;  %v550_v57 = vpop.permute.xlu1 %549 }
 0x1dd   :  { %v1482_v6 = vpop.eup %1481  ;;  %1501 = vtanh.f32 %v417_v0 }
 0x1de   :  { %v1484_v7 = vpop.eup %1483  ;;  %1503 = vtanh.f32 %v506_v3  ;;  %v1397_v8 = vpack.c.bf16 %v1482_v6, %v1474_v58 }
 0x1df   :  { %v1486_v9 = vpop.eup %1485  ;;  %v1405_v10 = vpack.c.bf16 %v1484_v7, %v1476_v62 }
 0x1e0   :  { %v1488_v11 = vpop.eup %1487  ;;  %v1395_v12 = vpack.c.bf16 %v1486_v9, %v1478_v2 }
 0x1e1   :  { %v1490_v13 = vpop.eup %1489  ;;  %v1403_v14 = vpack.c.bf16 %v1488_v11, %v1480_v4 }
 0x1e2   :  { %v1492_v15 = vpop.eup %1491  ;;  %1396 = vmatprep.subr.bf16.mxu0 %v1395_v12 }
 0x1e3   :  { %v1494_v16 = vpop.eup %1493  ;;  %1404 = vmatprep.subr.bf16.mxu1 %v1403_v14  ;;  %1398 = vmatpush1.bf16.msra.mxu0 %v1397_v8 }
 0x1e4   :  { %v1496_v17 = vpop.eup %1495  ;;  %1406 = vmatpush1.bf16.msra.mxu1 %v1405_v10 }
 0x1e5   :  { %v1498_v18 = vpop.eup %1497 }
 0x1e6   :  { %v1500_v19 = vpop.eup %1499  ;;  %v1401_v20 = vpack.c.bf16 %v1498_v18, %v1490_v13 }
 0x1e7   :  { %v1502_v21 = vpop.eup %1501  ;;  %v1409_v22 = vpack.c.bf16 %v1500_v19, %v1492_v15 }
 0x1e8   :  { %v1504_v23 = vpop.eup %1503  ;;  %v1399_v24 = vpack.c.bf16 %v1502_v21, %v1494_v16 }
 0x1e9   :  { %v1407_v25 = vpack.c.bf16 %v1504_v23, %v1496_v17  ;;  %v1817_v23 = vld [vmem:[%s1936_s0 + $0x28] sm:$0xff] }
 0x1ea   :  { %1400 = vmatprep.subr.bf16.mxu0 %v1399_v24  ;;  %v1822_v24 = vld [vmem:[%s1936_s0 + $0x8] sm:$0xff] }
 0x1eb   :  { %1408 = vmatprep.subr.bf16.mxu1 %v1407_v25  ;;  %1402 = vmatpush1.bf16.msra.mxu0 %v1401_v20 }
 0x1ec   :  { %1410 = vmatpush1.bf16.msra.mxu1 %v1409_v22 }
 0x1ee   :  { %1355 = vmatmul.mubr.msk.f32.vlgmr.msra.gmra.mrb[16].mxu0 %vm317_vm1, %v524_v26 }
 0x1ef   :  { %1359 = vmatmul.mubr.msk.f32.vlgmr.msra.gmra.mrb[16].mxu1 %vm317_vm1, %v524_v26  ;;  %634 = vmatprep.mubr.f32.mxu0 %v1593_v5 }
 0x1f0   :  { %723 = vmatprep.mubr.f32.mxu1 %v1593_v5 }
 0x1f2   :  { %1356 = vmatmul.mubr.msk.f32.gmra.mrb[18].mxu0 %vm317_vm1, %v525_v27 }
 0x1f3   :  { %1360 = vmatmul.mubr.msk.f32.gmra.mrb[18].mxu1 %vm317_vm1, %v525_v27  ;;  %640 = vmatprep.mubr.f32.mxu0 %v1593_v5  ;;  %v1827_v27 = vld [vmem:[%s1936_s0 + $0x38] sm:$0xff] }
 0x1f4   :  { %729 = vmatprep.mubr.f32.mxu1 %v1593_v5 }
 0x1f6   :  { %1357 = vmatmul.mubr.msk.f32.gmra.mrb[20].mxu0 %vm317_vm1, %v526_v28 }
 0x1f7   :  { %1361 = vmatmul.mubr.msk.f32.gmra.mrb[20].mxu1 %vm317_vm1, %v526_v28  ;;  %646 = vmatprep.mubr.f32.mxu0 %v1593_v5  ;;  %v1832_v28 = vld [vmem:[%s1936_s0 + $0x18] sm:$0xff] }
 0x1f8   :  { %735 = vmatprep.mubr.f32.mxu1 %v1593_v5 }
 0x1fa   :  { %1358 = vmatmul.mubr.msk.f32.gmra.mrb[22].mxu0 %vm317_vm1, %v527_v29 }
 0x1fb   :  { %1362 = vmatmul.mubr.msk.f32.gmra.mrb[22].mxu1 %vm317_vm1, %v527_v29  ;;  %862 = vmatprep.mubr.f32.mxu0 %v1593_v5 }
 0x1fc   :  { %951 = vmatprep.mubr.f32.mxu1 %v1593_v5 }
 0x2c1   :  { %v630_v31 = vpop.f32.mrb[16].mxu0 }
 0x2c2   :  { %v631_v32 = vadd.f32 %v630_v31, %v535_v30  ;;  %v719_v33 = vpop.f32.mrb[16].mxu1  ;;  %v632_v34 = vpop.f32.mrb[17].mxu0 }
 0x2c3   :  { %v720_v35 = vadd.f32 %v719_v33, %v535_v30  ;;  %v633_v36 = vadd.f32 %v632_v34, %v535_v30  ;;  %v721_v37 = vpop.f32.mrb[17].mxu1  ;;  %v1841_v33 = vld [vmem:[%s1936_s0 + $0x20] sm:$0xff] }
 0x2c4   :  { %1505 = vtanh.f32 %v631_v32  ;;  %v722_v38 = vadd.f32 %v721_v37, %v535_v30  ;;  %v1427_v30 = vpack.c.bf16 %v1817_v23, %v1822_v24  ;;  %v1431_v32 = vpack.c.bf16 %v1827_v27, %v1832_v28  ;;  %v1846_v34 = vld [vmem:[%s1936_s0] sm:$0xff]  ;;  %v1859_v37 = vld [vmem:[%s1936_s0 + $0x10] sm:$0xff] }
 0x2c5   :  { %1507 = vtanh.f32 %v720_v35  ;;  %v636_v40 = vpop.f32.mrb[18].mxu0  ;;  %v758_v35 = vld [vmem:[%s1946_s10] sm:$0xff] }
 0x2c6   :  { %1509 = vtanh.f32 %v633_v36  ;;  %v637_v41 = vadd.f32 %v636_v40, %v540_v39  ;;  %v725_v42 = vpop.f32.mrb[18].mxu1  ;;  %v638_v43 = vpop.f32.mrb[19].mxu0  ;;  %v1854_v36 = vld [vmem:[%s1936_s0 + $0x30] sm:$0xff]  ;;  %v759_v40 = vld [vmem:[%s1946_s10 + $0x8] sm:$0xff] }
 0x2c7   :  { %1511 = vtanh.f32 %v722_v38  ;;  %v726_v44 = vadd.f32 %v725_v42, %v540_v39  ;;  %v639_v45 = vadd.f32 %v638_v43, %v540_v39  ;;  %v727_v46 = vpop.f32.mrb[19].mxu1  ;;  %v1429_v38 = vpack.c.bf16 %v1841_v33, %v1846_v34  ;;  %v761_v42 = vld [vmem:[%s1946_s10 + $0x18] sm:$0xff]  ;;  %v992_v43 = vld [vmem:[%s1938_s2] sm:$0xff] }
 0x2c8   :  { %1513 = vtanh.f32 %v637_v41  ;;  %v728_v47 = vadd.f32 %v727_v46, %v540_v39  ;;  %v1433_v39 = vpack.c.bf16 %v1854_v36, %v1859_v37  ;;  %v760_v41 = vld [vmem:[%s1946_s10 + $0x10] sm:$0xff]  ;;  %v995_v46 = vld [vmem:[%s1938_s2 + $0x18] sm:$0xff] }
 0x2c9   :  { %1515 = vtanh.f32 %v726_v44  ;;  %v642_v49 = vpop.f32.mrb[20].mxu0  ;;  %v993_v44 = vld [vmem:[%s1938_s2 + $0x8] sm:$0xff] }
 0x2ca   :  { %1517 = vtanh.f32 %v639_v45  ;;  %v643_v50 = vadd.f32 %v642_v49, %v545_v48  ;;  %v731_v51 = vpop.f32.mrb[20].mxu1  ;;  %v644_v52 = vpop.f32.mrb[21].mxu0  ;;  %v994_v45 = vld [vmem:[%s1938_s2 + $0x10] sm:$0xff]  ;;  %s1596_s2 = smov [#allocation2]  }
 0x2cb   :  { %1519 = vtanh.f32 %v728_v47  ;;  %v732_v53 = vadd.f32 %v731_v51, %v545_v48  ;;  %v645_v54 = vadd.f32 %v644_v52, %v545_v48  ;;  %v733_v55 = vpop.f32.mrb[21].mxu1  ;;  %v774_v47 = vpop.permute.xlu1 %773  ;;  %s1331_s24 = sshll.u32 %s1596_s2, 4  ;;  %s1332_s24 = int_to_ptr.vmem [resolvable:$true] %s1331_s24 }
 0x2cc   :  { %1521 = vtanh.f32 %v643_v50  ;;  %v734_v56 = vadd.f32 %v733_v55, %v545_v48  ;;  %v769_v48 = vpop.permute.xlu0 %768  ;;  %s1569_s25 = scalar_lea.vmem %s1332_s24, 64  ;;  %p1574_p1 = scmp.lt.s32.totalorder %s1332_s24, %s1332_s24 }
 0x2cd   :  { %1523 = vtanh.f32 %v732_v53  ;;  %v648_v58 = vpop.f32.mrb[22].mxu0  ;;  %p1570_p0 = scmp.ne.s32.totalorder %s1332_s24, %s1569_s25  ;;  %p1575_p2 = scmp.lt.s32.totalorder %s1569_s25, %s1569_s25 }
 0x2ce   :  { %v1506_v59 = vpop.eup %1505  ;;  %1525 = vtanh.f32 %v645_v54  ;;  %v649_v60 = vadd.f32 %v648_v58, %v550_v57  ;;  %v737_v61 = vpop.f32.mrb[22].mxu1 }
 0x2cf   :  { %v650_v62 = vpop.f32.mrb[23].mxu0  ;;  %v1508_v63 = vpop.eup %1507  ;;  %1527 = vtanh.f32 %v734_v56  ;;  %v738_v0 = vadd.f32 %v737_v61, %v550_v57  ;;  %p1576_p3 = por %p1575_p2, %p1574_p1 }
 0x2d0   :  { %v651_v1 = vadd.f32 %v650_v62, %v550_v57  ;;  %v739_v2 = vpop.f32.mrb[23].mxu1  ;;  %v1510_v3 = vpop.eup %1509  ;;  %1529 = vtanh.f32 %v649_v60 }
 0x2d1   :  { %v740_v4 = vadd.f32 %v739_v2, %v550_v57  ;;  %v1512_v6 = vpop.eup %1511  ;;  %1531 = vtanh.f32 %v738_v0  ;;  %v784_v56 = vpop.permute.xlu1 %783  ;;  %p1577_p4 = pnand %p1576_p3, %p1570_p0 }
 0x2d2   :  { %v1514_v7 = vpop.eup %1513  ;;  %1533 = vtanh.f32 %v651_v1  ;;  %v779_v61 = vpop.permute.xlu0 %778 }
 0x2d3   :  { %v1516_v8 = vpop.eup %1515  ;;  %1535 = vtanh.f32 %v740_v4  ;;  %v1413_v9 = vpack.c.bf16 %v1514_v7, %v1506_v59 }
 0x2d4   :  { %v1518_v10 = vpop.eup %1517  ;;  %v1421_v11 = vpack.c.bf16 %v1516_v8, %v1508_v63 }
 0x2d5   :  { %v1520_v12 = vpop.eup %1519  ;;  %v1411_v13 = vpack.c.bf16 %v1518_v10, %v1510_v3 }
 0x2d6   :  { %v1522_v14 = vpop.eup %1521  ;;  %v1419_v15 = vpack.c.bf16 %v1520_v12, %v1512_v6 }
 0x2d7   :  { %v1524_v16 = vpop.eup %1523  ;;  %1412 = vmatprep.subr.bf16.mxu0 %v1411_v13 }
 0x2d8   :  { %v1526_v17 = vpop.eup %1525  ;;  %1420 = vmatprep.subr.bf16.mxu1 %v1419_v15  ;;  %1414 = vmatpush1.bf16.msra.mxu0 %v1413_v9  ;;  %v1249_v9 = vpop.permute.xlu1 %1248 }
 0x2d9   :  { %v1528_v18 = vpop.eup %1527  ;;  %1422 = vmatpush1.bf16.msra.mxu1 %v1421_v11  ;;  %v1244_v11 = vpop.permute.xlu0 %1243 }
 0x2da   :  { %v1530_v19 = vpop.eup %1529 }
 0x2db   :  { %v1532_v20 = vpop.eup %1531  ;;  %v1417_v21 = vpack.c.bf16 %v1530_v19, %v1522_v14 }
 0x2dc   :  { %v1534_v22 = vpop.eup %1533  ;;  %v1425_v25 = vpack.c.bf16 %v1532_v20, %v1524_v16 }
 0x2dd   :  { %v1536_v26 = vpop.eup %1535  ;;  %v1415_v29 = vpack.c.bf16 %v1534_v22, %v1526_v17  ;;  %v1255_v17 = vmul.f32 %v1249_v9, %v1841_v33  ;;  %v1257_v22 = vmul.f32 %v1249_v9, %v1854_v36 }
 0x2de   :  { %v1423_v31 = vpack.c.bf16 %v1536_v26, %v1528_v18  ;;  %v1256_v18 = vmul.f32 %v1249_v9, %v1817_v23  ;;  %v1258_v23 = vmul.f32 %v1249_v9, %v1827_v27 }
 0x2df   :  { %1416 = vmatprep.subr.bf16.mxu0 %v1415_v29 }
 0x2e0   :  { %1424 = vmatprep.subr.bf16.mxu1 %v1423_v31  ;;  %1418 = vmatpush1.bf16.msra.mxu0 %v1417_v21  ;;  %v1253_v31 = vmul.f32 %v1244_v11, %v1859_v37 }
 0x2e1   :  { %1426 = vmatpush1.bf16.msra.mxu1 %v1425_v25  ;;  %1428 = vmatprep.subr.bf16.mxu0 %v1427_v30  ;;  %v1251_v25 = vmul.f32 %v1244_v11, %v1846_v34  ;;  %v1252_v30 = vmul.f32 %v1244_v11, %v1822_v24 }
 0x2e2   :  { %1432 = vmatprep.subr.bf16.mxu1 %v1431_v32 }
 0x2e3   :  { %1363 = vmatmul.mubr.msk.f32.vlgmr.msra.gmra.mrb[24].mxu0 %vm317_vm1, %v758_v35 }
 0x2e4   :  { %1367 = vmatmul.mubr.msk.f32.vlgmr.msra.gmra.mrb[24].mxu1 %vm317_vm1, %v758_v35  ;;  %868 = vmatprep.mubr.f32.mxu0 %v1593_v5 }
 0x2e5   :  { %957 = vmatprep.mubr.f32.mxu1 %v1593_v5  ;;  %1430 = vmatpush1.bf16.msra.mxu0 %v1429_v38  ;;  %v1254_v38 = vmul.f32 %v1244_v11, %v1832_v28 }
 0x2e6   :  { %1434 = vmatpush1.bf16.msra.mxu1 %v1433_v39 }
 0x2e7   :  { %1364 = vmatmul.mubr.msk.f32.gmra.mrb[26].mxu0 %vm317_vm1, %v759_v40  ;;  %v1280_v28 = vadd.f32 %v1258_v23, %v1254_v38 }
 0x2e8   :  { %1368 = vmatmul.mubr.msk.f32.gmra.mrb[26].mxu1 %vm317_vm1, %v759_v40  ;;  %874 = vmatprep.mubr.f32.mxu0 %v1593_v5 }
 0x2e9   :  { %963 = vmatprep.mubr.f32.mxu1 %v1593_v5 }
 0x2eb   :  { %1365 = vmatmul.mubr.msk.f32.gmra.mrb[28].mxu0 %vm317_vm1, %v760_v41 }
 0x2ec   :  { %1369 = vmatmul.mubr.msk.f32.gmra.mrb[28].mxu1 %vm317_vm1, %v760_v41  ;;  %880 = vmatprep.mubr.f32.mxu0 %v1593_v5 }
 0x2ed   :  { %969 = vmatprep.mubr.f32.mxu1 %v1593_v5 }
 0x2ef   :  { %1366 = vmatmul.mubr.msk.f32.gmra.mrb[30].mxu0 %vm317_vm1, %v761_v42 }
 0x2f0   :  { %1370 = vmatmul.mubr.msk.f32.gmra.mrb[30].mxu1 %vm317_vm1, %v761_v42  ;;  %1073 = vmatprep.mubr.f32.mxu0 %v1593_v5 }
 0x2f1   :  { %1162 = vmatprep.mubr.f32.mxu1 %v1593_v5 }
 0x2f3   :  { %1371 = vmatmul.mubr.msk.f32.vlgmr.msra.gmra.mrb[32].mxu0 %vm996_vm2, %v992_v43 }
 0x2f4   :  { %1375 = vmatmul.mubr.msk.f32.vlgmr.msra.gmra.mrb[32].mxu1 %vm996_vm2, %v992_v43  ;;  %1079 = vmatprep.mubr.f32.mxu0 %v1593_v5 }
 0x2f5   :  { %1168 = vmatprep.mubr.f32.mxu1 %v1593_v5 }
 0x2f7   :  { %1372 = vmatmul.mubr.msk.f32.gmra.mrb[34].mxu0 %vm996_vm2, %v993_v44 }
 0x2f8   :  { %1376 = vmatmul.mubr.msk.f32.gmra.mrb[34].mxu1 %vm996_vm2, %v993_v44  ;;  %1085 = vmatprep.mubr.f32.mxu0 %v1593_v5  ;;  %v1259_v44 = vadd.f32 %v1255_v17, %v1251_v25 }
 0x2f9   :  { %1174 = vmatprep.mubr.f32.mxu1 %v1593_v5 }
 0x2fb   :  { %1373 = vmatmul.mubr.msk.f32.gmra.mrb[36].mxu0 %vm996_vm2, %v994_v45 }
 0x2fc   :  { %1377 = vmatmul.mubr.msk.f32.gmra.mrb[36].mxu1 %vm996_vm2, %v994_v45  ;;  %1091 = vmatprep.mubr.f32.mxu0 %v1593_v5 }
 0x2fd   :  { %1180 = vmatprep.mubr.f32.mxu1 %v1593_v5 }
 0x2ff   :  { %1374 = vmatmul.mubr.msk.f32.gmra.mrb[38].mxu0 %vm996_vm2, %v995_v46 }
 0x300   :  { %1378 = vmatmul.mubr.msk.f32.gmra.mrb[38].mxu1 %vm996_vm2, %v995_v46  ;;  %v1266_v46 = vadd.f32 %v1256_v18, %v1252_v30 }
 0x3b6   :  { %v864_v49 = vpop.f32.mrb[24].mxu0 }
 0x3b7   :  { %v865_v50 = vadd.f32 %v864_v49, %v769_v48  ;;  %v953_v51 = vpop.f32.mrb[24].mxu1  ;;  %v866_v52 = vpop.f32.mrb[25].mxu0 }
 0x3b8   :  { %v954_v53 = vadd.f32 %v953_v51, %v769_v48  ;;  %v955_v54 = vpop.f32.mrb[25].mxu1  ;;  %v867_v55 = vadd.f32 %v866_v52, %v769_v48 }
 0x3b9   :  { %v956_v57 = vadd.f32 %v955_v54, %v769_v48  ;;  %1537 = vtanh.f32 %v865_v50 }
 0x3ba   :  { %v870_v58 = vpop.f32.mrb[26].mxu0  ;;  %1539 = vtanh.f32 %v954_v53 }
 0x3bb   :  { %v871_v59 = vadd.f32 %v870_v58, %v774_v47  ;;  %v959_v60 = vpop.f32.mrb[26].mxu1  ;;  %v872_v5 = vpop.f32.mrb[27].mxu0  ;;  %1541 = vtanh.f32 %v867_v55 }
 0x3bc   :  { %v960_v62 = vadd.f32 %v959_v60, %v774_v47  ;;  %v961_v63 = vpop.f32.mrb[27].mxu1  ;;  %v873_v0 = vadd.f32 %v872_v5, %v774_v47  ;;  %1543 = vtanh.f32 %v956_v57  ;;  %v1260_v57 = vrot.slane %v1259_v44, 4 }
 0x3bd   :  { %v962_v1 = vadd.f32 %v961_v63, %v774_v47  ;;  %1545 = vtanh.f32 %v871_v59  ;;  %v1273_v47 = vadd.f32 %v1257_v22, %v1253_v31  ;;  %v1267_v5 = vrot.slane %v1266_v46, 4 }
 0x3be   :  { %v876_v2 = vpop.f32.mrb[28].mxu0  ;;  %1547 = vtanh.f32 %v960_v62 }
 0x3bf   :  { %v877_v3 = vadd.f32 %v876_v2, %v779_v61  ;;  %v965_v4 = vpop.f32.mrb[28].mxu1  ;;  %v878_v6 = vpop.f32.mrb[29].mxu0  ;;  %1549 = vtanh.f32 %v873_v0  ;;  %v1281_v2 = vrot.slane %v1280_v28, 4  ;;  %v1268_v17 = vadd.f32 %v1267_v5, %v1266_v46 }
 0x3c0   :  { %v966_v7 = vadd.f32 %v965_v4, %v779_v61  ;;  %v967_v8 = vpop.f32.mrb[29].mxu1  ;;  %v879_v10 = vadd.f32 %v878_v6, %v779_v61  ;;  %1551 = vtanh.f32 %v962_v1 }
 0x3c1   :  { %v968_v12 = vadd.f32 %v967_v8, %v779_v61  ;;  %1553 = vtanh.f32 %v877_v3  ;;  %v1274_v61 = vrot.slane %v1273_v47, 4  ;;  %v1282_v25 = vadd.f32 %v1281_v2, %v1280_v28 }
 0x3c2   :  { %v882_v13 = vpop.f32.mrb[30].mxu0  ;;  %1555 = vtanh.f32 %v966_v7 }
 0x3c3   :  { %v883_v14 = vadd.f32 %v882_v13, %v784_v56  ;;  %v971_v15 = vpop.f32.mrb[30].mxu1  ;;  %v884_v16 = vpop.f32.mrb[31].mxu0  ;;  %1557 = vtanh.f32 %v879_v10  ;;  %v1261_v13 = vadd.f32 %v1260_v57, %v1259_v44  ;;  %v1275_v18 = vadd.f32 %v1274_v61, %v1273_v47 }
 0x3c4   :  { %v972_v19 = vadd.f32 %v971_v15, %v784_v56  ;;  %v973_v20 = vpop.f32.mrb[31].mxu1  ;;  %v1538_v21 = vpop.eup %1537  ;;  %v885_v26 = vadd.f32 %v884_v16, %v784_v56  ;;  %1559 = vtanh.f32 %v968_v12 }
 0x3c5   :  { %v1540_v29 = vpop.eup %1539  ;;  %v974_v32 = vadd.f32 %v973_v20, %v784_v56  ;;  %1561 = vtanh.f32 %v883_v14  ;;  %v1262_v38 = vrot.slane %v1261_v13, 2 }
 0x3c6   :  { %v1075_v33 = vpop.f32.mrb[32].mxu0  ;;  %v1542_v35 = vpop.eup %1541  ;;  %1563 = vtanh.f32 %v972_v19 }
 0x3c7   :  { %v1187_v39 = vmul.f32 %v1538_v21, %v1075_v33  ;;  %v1164_v36 = vpop.f32.mrb[32].mxu1  ;;  %v1077_v40 = vpop.f32.mrb[33].mxu0  ;;  %1565 = vtanh.f32 %v885_v26  ;;  %v1263_v46 = vadd.f32 %v1262_v38, %v1261_v13 }
 0x3c8   :  { %v1544_v34 = vpop.eup %1543  ;;  %v1189_v41 = vmul.f32 %v1540_v29, %v1164_v36  ;;  %v1188_v42 = vmul.f32 %v1542_v35, %v1077_v40  ;;  %v1166_v43 = vpop.f32.mrb[33].mxu1  ;;  %1567 = vtanh.f32 %v974_v32  ;;  %v1269_v40 = vrot.slane %v1268_v17, 2 }
 0x3c9   :  { %v1546_v24 = vpop.eup %1545  ;;  %v1190_v37 = vmul.f32 %v1544_v34, %v1166_v43  ;;  %v1276_v34 = vrot.slane %v1275_v18, 2  ;;  %v1283_v43 = vrot.slane %v1282_v25, 2 }
 0x3ca   :  { %v1548_v45 = vpop.eup %1547  ;;  %v1081_v27 = vpop.f32.mrb[34].mxu0 }
 0x3cb   :  { %v1550_v48 = vpop.eup %1549  ;;  %v1191_v49 = vmul.f32 %v1546_v24, %v1081_v27  ;;  %v1170_v50 = vpop.f32.mrb[34].mxu1  ;;  %v1277_v28 = vadd.f32 %v1276_v34, %v1275_v18 }
 0x3cc   :  { %v1083_v51 = vpop.f32.mrb[35].mxu0  ;;  %v1552_v52 = vpop.eup %1551  ;;  %v1193_v53 = vmul.f32 %v1548_v45, %v1170_v50 }
 0x3cd   :  { %v1192_v54 = vmul.f32 %v1550_v48, %v1083_v51  ;;  %v1172_v55 = vpop.f32.mrb[35].mxu1  ;;  %v1554_v56 = vpop.eup %1553  ;;  %v1203_v58 = vadd.f32 %v1191_v49, %v1187_v39  ;;  %v1270_v48 = vadd.f32 %v1269_v40, %v1268_v17  ;;  %v1284_v51 = vadd.f32 %v1283_v43, %v1282_v25 }
 0x3ce   :  { %v1194_v59 = vmul.f32 %v1552_v52, %v1172_v55  ;;  %v1556_v60 = vpop.eup %1555  ;;  %v1221_v62 = vadd.f32 %v1193_v53, %v1189_v41  ;;  %v1087_v0 = vpop.f32.mrb[36].mxu0 }
 0x3cf   :  { %v1212_v63 = vadd.f32 %v1192_v54, %v1188_v42  ;;  %v1558_v1 = vpop.eup %1557  ;;  %v1195_v4 = vmul.f32 %v1554_v56, %v1087_v0  ;;  %v1176_v6 = vpop.f32.mrb[36].mxu1  ;;  %v1595_v56 = vmov 1966171168   ;;  %v1271_v61 = vrot.slane %v1270_v48, 1 }
 0x3d0   :  { %v1230_v3 = vadd.f32 %v1194_v59, %v1190_v37  ;;  %v1089_v7 = vpop.f32.mrb[37].mxu0  ;;  %v1560_v8 = vpop.eup %1559  ;;  %v1197_v9 = vmul.f32 %v1556_v60, %v1176_v6  ;;  %v1298_v57 = vunpack.c.l.s4 %v1595_v56  ;;  %v1264_v59 = vrot.slane %v1263_v46, 1 }
 0x3d1   :  { %v1196_v10 = vmul.f32 %v1558_v1, %v1089_v7  ;;  %v1178_v11 = vpop.f32.mrb[37].mxu1  ;;  %v1562_v12 = vpop.eup %1561  ;;  %v1204_v14 = vadd.f32 %v1203_v58, %v1195_v4  ;;  %v1300_v58 = vlaneseq  ;;  %v1285_v1 = vrot.slane %v1284_v51, 1 }
 0x3d2   :  { %v1198_v15 = vmul.f32 %v1560_v8, %v1178_v11  ;;  %v1564_v16 = vpop.eup %1563  ;;  %v1222_v19 = vadd.f32 %v1221_v62, %v1197_v9  ;;  %v1093_v21 = vpop.f32.mrb[38].mxu0  ;;  %v1278_v62 = vrot.slane %v1277_v28, 1  ;;  %v1299_v7 = vunpack.c.0.s8 %v1298_v57 }
 0x3d3   :  { %v1213_v20 = vadd.f32 %v1212_v63, %v1196_v10  ;;  %v1566_v22 = vpop.eup %1565  ;;  %v1199_v29 = vmul.f32 %v1562_v12, %v1093_v21  ;;  %v1182_v30 = vpop.f32.mrb[38].mxu1  ;;  %v1301_v8 = vshrl.u32 %v1300_v58, 7  ;;  %v1265_v9 = vadd.f32 %v1264_v59, %v1263_v46 }
 0x3d4   :  { %v1231_v26 = vadd.f32 %v1230_v3, %v1198_v15  ;;  %v1095_v31 = vpop.f32.mrb[39].mxu0  ;;  %v1568_v32 = vpop.eup %1567  ;;  %v1201_v33 = vmul.f32 %v1564_v16, %v1182_v30  ;;  %v1272_v12 = vadd.f32 %v1271_v61, %v1270_v48  ;;  %v1279_v13 = vadd.f32 %v1278_v62, %v1277_v28 }
 0x3d5   :  { %v1200_v35 = vmul.f32 %v1566_v22, %v1095_v31  ;;  %v1184_v23 = vpop.f32.mrb[39].mxu1  ;;  %v1205_v39 = vadd.f32 %v1204_v14, %v1199_v29  ;;  %v1286_v16 = vadd.f32 %v1285_v1, %v1284_v51  ;;  %v1302_v21 = vsub.s32 %v1299_v7, %v1301_v8 }
 0x3d6   :  { %v1202_v36 = vmul.f32 %v1568_v32, %v1184_v23  ;;  %v1223_v41 = vadd.f32 %v1222_v19, %v1201_v33  ;;  %vm1322_vm3 = vcmp.lt.s32.totalorder %v1300_v58, 512 }
 0x3d7   :  { %v1214_v42 = vadd.f32 %v1213_v20, %v1200_v35  ;;  %v1206_v24 = vrot.slane %v1205_v39, 4 }
 0x3d8   :  { %v1232_v44 = vadd.f32 %v1231_v26, %v1202_v36  ;;  %v1224_v37 = vrot.slane %v1223_v41, 4 }
 0x3d9   :  { %v1215_v45 = vrot.slane %v1214_v42, 4  ;;  %v1207_v47 = vadd.f32 %v1206_v24, %v1205_v39 }
 0x3da   :  { %v1233_v27 = vrot.slane %v1232_v44, 4  ;;  %v1225_v49 = vadd.f32 %v1224_v37, %v1223_v41 }
 0x3db   :  { %v1216_v50 = vadd.f32 %v1215_v45, %v1214_v42  ;;  %v1208_v52 = vrot.slane %v1207_v47, 2 }
 0x3dc   :  { %v1234_v53 = vadd.f32 %v1233_v27, %v1232_v44  ;;  %v1226_v54 = vrot.slane %v1225_v49, 2 }
 0x3dd   :  { %v1217_v55 = vrot.slane %v1216_v50, 2  ;;  %v1209_v60 = vadd.f32 %v1208_v52, %v1207_v47 }
 0x3de   :  { %v1235_v5 = vrot.slane %v1234_v53, 2  ;;  %v1227_v63 = vadd.f32 %v1226_v54, %v1225_v49 }
 0x3df   :  { %v1218_v0 = vadd.f32 %v1217_v55, %v1216_v50  ;;  %v1210_v2 = vrot.slane %v1209_v60, 1 }
 0x3e0   :  { %v1236_v3 = vadd.f32 %v1235_v5, %v1234_v53  ;;  %v1228_v4 = vrot.slane %v1227_v63, 1 }
 0x3e1   :  { %v1219_v6 = vrot.slane %v1218_v0, 1  ;;  %v1211_v10 = vadd.f32 %v1210_v2, %v1209_v60 }
 0x3e2   :  { %v1237_v11 = vrot.slane %v1236_v3, 1  ;;  %v1229_v14 = vadd.f32 %v1228_v4, %v1227_v63 }
 0x3e3   :  { %v1220_v15 = vadd.f32 %v1219_v6, %v1218_v0  ;;  %v1287_v17 = vadd.f32 %v1265_v9, %v1211_v10 }
 0x3e4   :  { %v1238_v18 = vadd.f32 %v1237_v11, %v1236_v3  ;;  %v1289_v19 = vadd.f32 %v1279_v13, %v1229_v14 }
 0x3e5   :  { %v1288_v20 = vadd.f32 %v1272_v12, %v1220_v15 }
 0x3e6   :  { %v1290_v22 = vadd.f32 %v1286_v16, %v1238_v18 }
 0x3e7   :  { %v1295_v25 = vcombine.low %v1287_v17, %v1288_v20 }
 0x3e8   :  { %v1296_v26 = vcombine.low %v1289_v19, %v1290_v22 }
 0x3e9   :  { %v1303_v29 = vrot.slane %v1295_v25, %v1302_v21 }
 0x3ea   :  { %v1310_v30 = vrot.slane %v1296_v26, %v1302_v21 }
 0x3ec   :  { %v1311_v31 = vcombine.low %v1303_v29, %v1310_v30 }
 0x3ee   :  { %v1318_v32 = vrot.slane %v1311_v31, %v1302_v21 }
 0x3f0   :  { %1324 = vst.msk [vmem:[#allocation2] sm:$0xf] %vm1322_vm3, %v1318_v32 }
 0x3f1   :  { %1580 = shalt.err (!%p1577_p4)
}
 0x3f2   :  { %s1581_s9 = scalar_lea.hbm %s1948_s12, 64 }
 0x3f3   :  { %p1582_p5 = scmp.ne.s32.totalorder %s1948_s12, %s1581_s9  ;;  %p1585_p6 = scmp.lt.u32.totalorder %s1581_s9, %s1948_s12 }
 0x3f5   :  { %p1587_p7 = pnand %p1585_p6, %p1582_p5 }
 0x3f7   :  { %1590 = shalt.err (!%p1587_p7)
}
 0x3f8   :  { %1334 = dma.vmem_to_hbm [thread:$0]  %s1332_s24, 64, %s1948_s12, [#allocation3]  }
 0x3f9   :  { %1591 = dma.done.wait [#allocation3], 64  }
 0x3fa   :  { %1592 = vsyncadd [#allocation3], 4294967232 }
 0x3fb   :  { %1338 = vsyncpa [#allocation3], 1 }

</bundles_post_ra>
